<compile_context>
chip_gen: v5e
topology: v5e:2x2
jax: 0.10.0
libtpu: 0.0.40
codegen_flags: <defaults>
</compile_context>

<pallas_src>
import math
import numpy as np
import jax
import jax.numpy as jnp
from jax import lax
from jax.experimental import pallas as pl
from jax.experimental.pallas import tpu as pltpu

NEG_SLOPE = 0.2
LRELU_SCALE = 2.0 ** 0.5                      # FusedLeakyReLU scale

_BLUR_K = np.outer([1.0, 3.0, 3.0, 1.0], [1.0, 3.0, 3.0, 1.0])
_BLUR_K = (_BLUR_K / _BLUR_K.sum()).astype(np.float32)   # == /64

_VMEM_LIMIT_CACHE = None


def _vmem_limit_bytes():
    """Generation-aware VMEM budget: ~100 MiB on v5e/v6e (128 MiB VMEM), ~36 MiB on v7x (64 MiB)."""
    global _VMEM_LIMIT_CACHE
    if _VMEM_LIMIT_CACHE is None:
        try:
            cap = int(pltpu.get_tpu_info().vmem_capacity_bytes)
            _VMEM_LIMIT_CACHE = int(min(max(cap - (28 << 20), 32 << 20), 100 << 20))
        except Exception:                      # info API unavailable -> safe everywhere
            _VMEM_LIMIT_CACHE = 48 << 20
    return _VMEM_LIMIT_CACHE


def _round_up(v, m):
    return (v + m - 1) // m * m


def _pick_tile(dim, target, align):
    """Largest tile <= target that divides `dim` and is `align`-aligned, else full dim."""
    if dim <= target:
        return dim
    t = (target // align) * align
    while t >= align:
        if dim % t == 0:
            return t
        t -= align
    # TODO(synk): pad the dim instead of falling back for pathological (non 2^k) sizes.
    return dim


# ---------------------------------------------------------------------------
# Pallas kernel 1: tiled matmul + bias + scaled leaky-relu
#   bias folded into the k==0 accumulator init; lrelu scale folded into the select
# ---------------------------------------------------------------------------
def matmul_bias_lrelu(x, w, b, out_dtype=jnp.bfloat16, tm=1024, tn=256, tk=512):
    """out = sqrt(2) * leaky_relu(x @ w + b, 0.2), tiled over (M, N, K)."""
    M, K = x.shape
    K2, N = w.shape
    assert K == K2
    tm = _pick_tile(M, tm, 8)
    tn = _pick_tile(N, tn, 128)
    tk = _pick_tile(K, tk, 128)
    nk = K // tk
    b2 = b.reshape(1, N).astype(jnp.float32)

    def kernel(x_ref, w_ref, b_ref, o_ref, acc_ref):
        k = pl.program_id(2)

        @pl.when(k == 0)
        def _():
            acc_ref[...] = jnp.broadcast_to(b_ref[...], acc_ref.shape)

        acc_ref[...] += jnp.dot(x_ref[...], w_ref[...],
                                preferred_element_type=jnp.float32)

        @pl.when(k == nk - 1)
        def _():
            y = acc_ref[...]
            y = jnp.where(y >= 0, y * LRELU_SCALE, y * (NEG_SLOPE * LRELU_SCALE))
            o_ref[...] = y.astype(o_ref.dtype)

    return pl.pallas_call(
        kernel,
        out_shape=jax.ShapeDtypeStruct((M, N), out_dtype),
        grid=(M // tm, N // tn, nk),
        in_specs=[
            pl.BlockSpec((tm, tk), lambda i, j, k: (i, k)),
            pl.BlockSpec((tk, tn), lambda i, j, k: (k, j)),
            pl.BlockSpec((1, tn), lambda i, j, k: (0, j)),
        ],
        out_specs=pl.BlockSpec((tm, tn), lambda i, j, k: (i, j)),
        scratch_shapes=[pltpu.VMEM((tm, tn), jnp.float32)],
        compiler_params=pltpu.CompilerParams(
            dimension_semantics=("parallel", "parallel", "arbitrary"),
            vmem_limit_bytes=_vmem_limit_bytes()),
    )(x.astype(jnp.bfloat16), w.astype(jnp.bfloat16), b2)


# ---------------------------------------------------------------------------
# Blur folding: Blur([1,3,3,1], pad=(2,2)) o Conv3x3/s2  ==  pad(2) + Conv6x6/s2
# with Wc = full_conv2d(W, blur).  After a 2x2 space-to-depth of the padded input
# the 6x6/s2 conv becomes a 3x3/s1 conv over 4*Cin channels:
#   W_taps[pi*3+qi, (e*2+f)*Cin + c, co] = Wc[co, c, 2*pi+e, 2*qi+f]
# ---------------------------------------------------------------------------
def fold_blur_to_taps(w_oihw):
    cout, cin = w_oihw.shape[:2]
    k = jnp.asarray(_BLUR_K)
    wc = jnp.zeros((cout, cin, 6, 6), jnp.float32)
    for u in range(3):
        for v in range(3):
            wc = wc.at[:, :, u:u + 4, v:v + 4].add(
                w_oihw[:, :, u:u + 1, v:v + 1] * k[None, None, :, :])
    wc = wc.reshape(cout, cin, 3, 2, 3, 2)                 # p=(pi,e), q=(qi,f)
    taps = jnp.transpose(wc, (2, 4, 3, 5, 1, 0))           # (pi,qi,e,f,cin,cout)
    return taps.reshape(9, 4 * cin, cout)


# ---------------------------------------------------------------------------
# Pallas kernel 2: fused (blur-folded) downsample conv + bias + lrelu
# ---------------------------------------------------------------------------
def _choose_rows(ho, wo, ct, max_rows, acc_budget_bytes=8 << 20):
    """Largest even divisor of ho <= max_rows whose f32 accumulator fits the budget."""
    for tr in range(min(ho, max_rows), 1, -1):
        if ho % tr == 0 and tr % 2 == 0 and tr * wo * ct * 4 <= acc_budget_bytes:
            return tr
    assert ho % 2 == 0, "odd output heights are not supported"
    return 2


def conv_down_block(x, w_taps, b, max_rows_per_strip=16, cout_tile=256):
    """Blur + EqualConv2d(3x3, stride 2, no conv bias) + FusedLeakyReLU with the blur
    folded into `w_taps` and no im2col materialization.

    x: (N, H, W, Cin) bf16, H/W multiples of 4.   w_taps: (9, 4*Cin, Cout) bf16.
    b: (Cout,) f32.   returns (N, H/2, W/2, Cout) bf16.
    """
    n, h, w, cin = x.shape
    assert h % 4 == 0 and w % 4 == 0
    ho, wo = h // 2, w // 2
    hs, ws = ho + 2, wo + 2
    c4 = 4 * cin
    cout = w_taps.shape[-1]

    # pad(2) + 2x2 space-to-depth: the only wrapper-side copy of the activation.
    xp = jnp.pad(x, ((0, 0), (2, 2), (2, 2), (0, 0)))
    xs = xp.reshape(n, hs, 2, ws, 2, cin)
    xs = jnp.transpose(xs, (0, 1, 3, 2, 4, 5)).reshape(n, hs, ws, c4)

    ct = _pick_tile(cout, cout_tile, 128)
    nct = cout // ct
    tr = _choose_rows(ho, wo, ct, max_rows_per_strip)
    s = ho // tr

    def kernel(body_ref, halo_ref, w_ref, b_ref, o_ref, win_ref):
        # Assemble the (tr+2)-row halo window from the two overlapping BlockSpec
        # views (no wrapper-side strip stacking / halo duplication in HBM).
        win_ref[0:tr] = body_ref[0]
        win_ref[tr:tr + 2] = halo_ref[0]
        # Three column-shifted copies of the whole window: one unaligned sublane
        # slice per dj instead of one per (row, tap).
        sh = [win_ref[:, dj:dj + wo, :] for dj in range(3)]
        # One strip-wide matmul per tap: (tr*wo, c4) @ (c4, ct); bias folded into init.
        acc = jnp.broadcast_to(b_ref[...], (tr * wo, ct))
        for di in range(3):
            for dj in range(3):
                lhs = sh[dj][di:di + tr].reshape(tr * wo, c4)
                acc = acc + jnp.dot(lhs, w_ref[di * 3 + dj],
                                    preferred_element_type=jnp.float32)
        y = jnp.where(acc >= 0, acc * LRELU_SCALE, acc * (NEG_SLOPE * LRELU_SCALE))
        o_ref[0] = y.reshape(tr, wo, ct).astype(o_ref.dtype)

    # Grid (batch, strip, cout-tile): ci is innermost, so the activation window's
    # block indices do not change across cout tiles and Pallas keeps it resident.
    # TODO(synk): stream overlapping windows straight from HBM with make_async_copy
    # double-buffering to also drop the pad+space-to-depth copy for very large images.
    out = pl.pallas_call(
        kernel,
        out_shape=jax.ShapeDtypeStruct((n, ho, wo, cout), jnp.bfloat16),
        grid=(n, s, nct),
        in_specs=[
            pl.BlockSpec((1, tr, ws, c4), lambda bi, si, ci: (bi, si, 0, 0)),
            pl.BlockSpec((1, 2, ws, c4),
                         lambda bi, si, ci: (bi, (si + 1) * (tr // 2), 0, 0)),
            pl.BlockSpec((9, c4, ct), lambda bi, si, ci: (0, 0, ci)),
            pl.BlockSpec((1, ct), lambda bi, si, ci: (0, ci)),
        ],
        out_specs=pl.BlockSpec((1, tr, wo, ct), lambda bi, si, ci: (bi, si, 0, ci)),
        scratch_shapes=[pltpu.VMEM((tr + 2, ws, c4), jnp.bfloat16)],
        compiler_params=pltpu.CompilerParams(
            dimension_semantics=("parallel", "parallel", "parallel"),
            vmem_limit_bytes=_vmem_limit_bytes()),
    )(xs, xs, w_taps.astype(jnp.bfloat16), b.reshape(1, cout).astype(jnp.float32))
    return out


# ---------------------------------------------------------------------------
# Parameters (same init scheme / shapes / scales as the PyTorch module).
# All channel dims are zero-padded to multiples of 128 for lane-dense stores;
# padded channels stay exactly 0 through every layer.
# ---------------------------------------------------------------------------
def init_params(key, size, style_dim, expression_dim, channel_multiplier=2, narrow=1):
    channels = {
        4: int(512 * narrow), 8: int(512 * narrow), 16: int(512 * narrow),
        32: int(512 * narrow), 64: int(256 * channel_multiplier * narrow),
        128: int(128 * channel_multiplier * narrow),
        256: int(64 * channel_multiplier * narrow),
        512: int(32 * channel_multiplier * narrow),
        1024: int(16 * channel_multiplier * narrow),
    }
    log_size = int(math.log(size, 2))
    keys = iter(jax.random.split(key, 64))
    params = {"log_size": log_size}

    # ecd0: EqualConv2d(3, channels[size], k=1, no conv bias) + FusedLeakyReLU
    c0 = channels[size]
    c0p = _round_up(c0, 128)
    w = jax.random.normal(next(keys), (c0, 3, 1, 1), jnp.float32) * (1.0 / math.sqrt(3))
    w01 = w.reshape(c0, 3).T                                # (3, c0)
    w01p = jnp.zeros((3, c0p), jnp.float32).at[:, :c0].set(w01)
    params["ecd0"] = {"w": w01p.astype(jnp.bfloat16),
                      "b": jnp.zeros((c0p,), jnp.float32),
                      "c_real": c0}

    # downsample layers: Blur + EqualConv2d(3x3, s=2, no bias) + FusedLeakyReLU
    in_ch, in_ch_p = c0, c0p
    down = []
    for i in range(log_size, 2, -1):
        out_ch = channels[2 ** (i - 1)]
        out_ch_p = _round_up(out_ch, 128)
        w = jax.random.normal(next(keys), (out_ch, in_ch, 3, 3), jnp.float32)
        w = w * (1.0 / math.sqrt(in_ch * 9))                # EqualConv2d scale
        wp = jnp.zeros((out_ch_p, in_ch_p, 3, 3), jnp.float32).at[:out_ch, :in_ch].set(w)
        down.append({
            "w_raw": w,                                      # f32, for the reference check
            "w_taps": fold_blur_to_taps(wp).astype(jnp.bfloat16),
            "b": jnp.zeros((out_ch_p,), jnp.float32),
            "c_real": out_ch,
        })
        in_ch, in_ch_p = out_ch, out_ch_p
    params["down"] = down

    # final EqualLinear(channels[4]*4*4 -> style_dim - expression_dim, fused_lrelu)
    in_dim = channels[4] * 4 * 4
    out_dim = style_dim - expression_dim
    w = jax.random.normal(next(keys), (out_dim, in_dim), jnp.float32) * (1.0 / math.sqrt(in_dim))
    params["final"] = {"w": w.T.astype(jnp.bfloat16),
                       "b": jnp.zeros((out_dim,), jnp.float32)}
    return params


# ---------------------------------------------------------------------------
# Forward pass (matches StylizedExpressionEncoder.forward)
# ---------------------------------------------------------------------------
def stylized_expression_encoder(params, x_nchw):
    log_size = params["log_size"]
    n = x_nchw.shape[0]
    x = jnp.transpose(x_nchw, (0, 2, 3, 1)).astype(jnp.bfloat16)  # NHWC, bf16 activations

    temp = []                                                 # (padded activation, real C)

    # ecd0: 1x1 conv + FusedLeakyReLU  (rows = N*H*W, K = 3); large tm for this
    # purely mem-bound layer.
    _, h, w_, ci = x.shape
    y = matmul_bias_lrelu(x.reshape(n * h * w_, ci), params["ecd0"]["w"],
                          params["ecd0"]["b"], out_dtype=jnp.bfloat16, tm=4096)
    x = y.reshape(n, h, w_, -1)
    temp.append((x, params["ecd0"]["c_real"]))

    # downsample blocks (blur folded into the conv)
    for layer in params["down"]:
        x = conv_down_block(x, layer["w_taps"], layer["b"])
        temp.append((x, layer["c_real"]))

    # slice channel padding off, flatten in PyTorch NCHW order, final EqualLinear
    x_last, c_last = temp[-1]
    flat = jnp.transpose(x_last[..., :c_last], (0, 3, 1, 2)).reshape(n, -1)
    outs = matmul_bias_lrelu(flat, params["final"]["w"], params["final"]["b"],
                             out_dtype=jnp.float32)

    temp = temp[::-1]
    noises = []
    for i in range(log_size * 2 - 3):
        if i == 4:
            t, c_real = temp[2]
            noises.append(jnp.transpose(t[..., :c_real], (0, 3, 1, 2)).astype(jnp.float32))
        else:
            noises.append(None)
    return outs, noises


# ---------------------------------------------------------------------------
# Pure-XLA f32 reference (mirrors the PyTorch op sequence) for validation
# ---------------------------------------------------------------------------
def _lrelu_ref(y, b):
    y = y + b.reshape((1,) * (y.ndim - 1) + (-1,)).astype(y.dtype)
    return jnp.where(y >= 0, y, NEG_SLOPE * y) * LRELU_SCALE


def _blur_ref(x_nhwc):
    c = x_nhwc.shape[-1]
    kern = jnp.tile(jnp.asarray(_BLUR_K)[:, :, None, None], (1, 1, 1, c))  # (4,4,1,C)
    xp = jnp.pad(x_nhwc, ((0, 0), (2, 2), (2, 2), (0, 0)))
    return lax.conv_general_dilated(xp, kern, (1, 1), "VALID",
                                    dimension_numbers=("NHWC", "HWIO", "NHWC"),
                                    feature_group_count=c)


def _conv3x3_s2_ref(x_nhwc, w_oihw):
    w_hwio = jnp.transpose(w_oihw, (2, 3, 1, 0))
    return lax.conv_general_dilated(x_nhwc, w_hwio, (2, 2), "VALID",
                                    dimension_numbers=("NHWC", "HWIO", "NHWC"))


def reference_forward(params, x_nchw):
    log_size = params["log_size"]
    n = x_nchw.shape[0]
    x = jnp.transpose(x_nchw, (0, 2, 3, 1)).astype(jnp.float32)
    temp = []
    c0 = params["ecd0"]["c_real"]
    w0 = params["ecd0"]["w"][:, :c0].astype(jnp.float32)
    y = jnp.einsum("nhwc,cd->nhwd", x, w0)
    x = _lrelu_ref(y, params["ecd0"]["b"][:c0])
    temp.append(x)
    for layer in params["down"]:
        xb = _blur_ref(x)
        y = _conv3x3_s2_ref(xb, layer["w_raw"])
        x = _lrelu_ref(y, layer["b"][:layer["c_real"]])
        temp.append(x)
    flat = jnp.transpose(x, (0, 3, 1, 2)).reshape(n, -1)
    outs = _lrelu_ref(flat @ params["final"]["w"].astype(jnp.float32), params["final"]["b"])
    temp = temp[::-1]
    noises = []
    for i in range(log_size * 2 - 3):
        noises.append(jnp.transpose(temp[2], (0, 3, 1, 2)) if i == 4 else None)
    return outs, noises


# ---------------------------------------------------------------------------
if __name__ == "__main__":
    # small config: size=16 -> ecd0 (1x1), two blur+stride-2 convs (16->8->4);
    # narrow=1/16 keeps channels[*]=32; output dim = style_dim - expression_dim = 32
    size, style_dim, expression_dim, narrow = 16, 48, 16, 0.0625

    key = jax.random.PRNGKey(0)
    k_x, k_p = jax.random.split(key)
    x = jax.random.normal(k_x, (2, 3, size, size), jnp.float32)  # NCHW like PyTorch

    params = init_params(k_p, size, style_dim, expression_dim,
                         channel_multiplier=2, narrow=narrow)

    outs, noises = stylized_expression_encoder(params, x)
    jax.block_until_ready(outs)
    for nz in noises:
        if nz is not None:
            jax.block_until_ready(nz)

    assert outs.shape == (2, style_dim - expression_dim)
    assert len(noises) == int(math.log(size, 2)) * 2 - 3
    assert noises[4].shape == (2, int(512 * narrow), size, size)

    # numerical check vs a pure-XLA f32 reference of the PyTorch op sequence
    # (bf16 operands/activations -> loose tolerance)
    ref_outs, ref_noises = reference_forward(params, x)
    np.testing.assert_allclose(np.asarray(outs), np.asarray(ref_outs),
                               rtol=0.15, atol=0.15)
    np.testing.assert_allclose(np.asarray(noises[4]), np.asarray(ref_noises[4]),
                               rtol=0.15, atol=0.15)

    print("KERNEL_OK")
</pallas_src>

<mosaic_0001>
module attributes {stable_mosaic.version = 11 : i64} {
  func.func @kernel(%arg0: i32, %arg1: i32, %arg2: i32, %arg3: memref<512x3xbf16, #tpu.memory_space<vmem>>, %arg4: memref<3x128xbf16, #tpu.memory_space<vmem>>, %arg5: memref<1x128xf32, #tpu.memory_space<vmem>>, %arg6: memref<512x128xbf16, #tpu.memory_space<vmem>>, %arg7: memref<512x128xf32, #tpu.memory_space<vmem>>) attributes {dimension_semantics = [#tpu.dimension_semantics<parallel>, #tpu.dimension_semantics<parallel>, #tpu.dimension_semantics<arbitrary>], iteration_bounds = array<i64: 1, 1, 1>, scalar_prefetch = 0 : i64, scratch_operands = 1 : i64, tpu.core_type = #tpu.core_type<tc>, window_params = [{transform_indices = @transform_0, window_bounds = array<i64: 512, 3>}, {transform_indices = @transform_1, window_bounds = array<i64: 3, 128>}, {transform_indices = @transform_2, window_bounds = array<i64: 1, 128>}, {transform_indices = @transform_3, window_bounds = array<i64: 512, 128>}]} {
    %c0_i32 = arith.constant 0 : i32
    %0 = arith.cmpi eq, %arg2, %c0_i32 : i32
    %1 = arith.extui %0 : i1 to i32
    %c0_i32_0 = arith.constant 0 : i32
    %2 = arith.cmpi ne, %1, %c0_i32_0 : i32
    scf.if %2 {
      %c0_10 = arith.constant 0 : index
      %c0_11 = arith.constant 0 : index
      %12 = vector.load %arg5[%c0_10, %c0_11] : memref<1x128xf32, #tpu.memory_space<vmem>>, vector<1x128xf32>
      %13 = vector.shape_cast %12 : vector<1x128xf32> to vector<1x128xf32>
      %14 = vector.broadcast %13 : vector<1x128xf32> to vector<512x128xf32>
      %c0_12 = arith.constant 0 : index
      %c0_13 = arith.constant 0 : index
      %15 = vector.load %arg7[%c0_12, %c0_13] : memref<512x128xf32, #tpu.memory_space<vmem>>, vector<512x128xf32>
      tpu.vector_store %arg7[%c0_12, %c0_13], %14 {strides = array<i32>} : memref<512x128xf32, #tpu.memory_space<vmem>>, vector<512x128xf32>,
    } else {
    }
    %c0 = arith.constant 0 : index
    %c0_1 = arith.constant 0 : index
    %3 = vector.load %arg7[%c0, %c0_1] : memref<512x128xf32, #tpu.memory_space<vmem>>, vector<512x128xf32>
    %c0_2 = arith.constant 0 : index
    %c0_3 = arith.constant 0 : index
    %4 = vector.load %arg3[%c0_2, %c0_3] : memref<512x3xbf16, #tpu.memory_space<vmem>>, vector<512x3xbf16>
    %c0_4 = arith.constant 0 : index
    %c0_5 = arith.constant 0 : index
    %5 = vector.load %arg4[%c0_4, %c0_5] : memref<3x128xbf16, #tpu.memory_space<vmem>>, vector<3x128xbf16>
    %cst = arith.constant dense<0.000000e+00> : vector<512x128xf32>
    %6 = tpu.matmul %4, %5, %cst {dimension_numbers = #tpu.dot_dimension_numbers<[1], [0], [0], [1], [0, 0, 1, 1], [], []>} : vector<512x3xbf16>, vector<3x128xbf16>, vector<512x128xf32> -> vector<512x128xf32>
    %7 = arith.addf %3, %6 : vector<512x128xf32>
    %c0_6 = arith.constant 0 : index
    %c0_7 = arith.constant 0 : index
    %8 = vector.load %arg7[%c0_6, %c0_7] : memref<512x128xf32, #tpu.memory_space<vmem>>, vector<512x128xf32>
    tpu.vector_store %arg7[%c0_6, %c0_7], %7 {strides = array<i32>} : memref<512x128xf32, #tpu.memory_space<vmem>>, vector<512x128xf32>,
    %c0_i32_8 = arith.constant 0 : i32
    %9 = arith.cmpi eq, %arg2, %c0_i32_8 : i32
    %10 = arith.extui %9 : i1 to i32
    %c0_i32_9 = arith.constant 0 : i32
    %11 = arith.cmpi ne, %10, %c0_i32_9 : i32
    scf.if %11 {
      %c0_10 = arith.constant 0 : index
      %c0_11 = arith.constant 0 : index
      %12 = vector.load %arg7[%c0_10, %c0_11] : memref<512x128xf32, #tpu.memory_space<vmem>>, vector<512x128xf32>
      %cst_12 = arith.constant 0.000000e+00 : f32
      %13 = vector.broadcast %cst_12 : f32 to vector<512x128xf32>
      %14 = arith.cmpf oge, %12, %13 : vector<512x128xf32>
      %cst_13 = arith.constant 1.41421354 : f32
      %15 = vector.broadcast %cst_13 : f32 to vector<512x128xf32>
      %16 = arith.mulf %12, %15 : vector<512x128xf32>
      %cst_14 = arith.constant 0.282842726 : f32
      %17 = vector.broadcast %cst_14 : f32 to vector<512x128xf32>
      %18 = arith.mulf %12, %17 : vector<512x128xf32>
      %19 = arith.select %14, %16, %18 : vector<512x128xi1>, vector<512x128xf32>
      %20 = arith.truncf %19 : vector<512x128xf32> to vector<512x128xbf16>
      %c0_15 = arith.constant 0 : index
      %c0_16 = arith.constant 0 : index
      %21 = vector.load %arg6[%c0_15, %c0_16] : memref<512x128xbf16, #tpu.memory_space<vmem>>, vector<512x128xbf16>
      tpu.vector_store %arg6[%c0_15, %c0_16], %20 {strides = array<i32>} : memref<512x128xbf16, #tpu.memory_space<vmem>>, vector<512x128xbf16>,
    } else {
    }
    return
  }
  func.func @transform_0(%arg0: i32, %arg1: i32, %arg2: i32) -> (i32, i32) {
    %c0_i32 = arith.constant 0 : i32
    return %arg0, %arg2 : i32, i32
  }
  func.func @transform_1(%arg0: i32, %arg1: i32, %arg2: i32) -> (i32, i32) {
    %c0_i32 = arith.constant 0 : i32
    return %arg2, %arg1 : i32, i32
  }
  func.func @transform_2(%arg0: i32, %arg1: i32, %arg2: i32) -> (i32, i32) {
    %c0_i32 = arith.constant 0 : i32
    %c0_i32_0 = arith.constant 0 : i32
    return %c0_i32, %arg1 : i32, i32
  }
  func.func @transform_3(%arg0: i32, %arg1: i32, %arg2: i32) -> (i32, i32) {
    %c0_i32 = arith.constant 0 : i32
    return %arg0, %arg1 : i32, i32
  }
}

</mosaic_0001>

<bundles_post_ra>
// kernel: tpu_custom_call.1
= control target key start
LH: loop header
LB: loop body
LE: loop exit
PB: predicated region body
PF: predicated region fallthrough
CT: control target
= control target key end

     0   :  { %vm474_vm0 = vcmask 1040384   ;;  %vm475_vm1 = vcmask 1041408   ;;  %v1664_v1 = vmov 65535   ;;  %s1910_s0 = inlined_call_operand.vmem [shape: bf16[512,3], index: 0, kind: input, shape index: {}]   ;;  %s1911_s1 = inlined_call_operand.vmem [shape: bf16[3,128], index: 1, kind: input, shape index: {}]   ;;  %s1912_s2 = inlined_call_operand.vmem [shape: f32[1,128], index: 2, kind: input, shape index: {}]   ;;  %s1913_s3 = inlined_call_operand.hbm [shape: bf16[512,128], index: 3, kind: output, shape index: {}]  }
   0x1   :  { %v216_v0 = vld [vmem:[%s1911_s1] sm:$0x3]  ;;  %v476_v2 = vsel %vm474_vm0, 4294967295, %v1664_v1 }
   0x2   :  { %v477_v3 = vsel %vm475_vm1, %v476_v2, 0  ;;  %v1407_v5 = vld [vmem:[%s1910_s0] sm:$0xff] }
   0x3   :  { %v479_v4 = vand.u32 %v477_v3, %v216_v0  ;;  %v1415_v6 = vld [vmem:[%s1910_s0 + $0x40] sm:$0xff] }
   0x4   :  { %8 = vsyncpa [#allocation4], 0  ;;  %vm377_vm2 = vcmask 23552   ;;  %v1423_v7 = vld [vmem:[%s1910_s0 + $0x80] sm:$0xff]  ;;  %v1408_v9 = vld [vmem:[%s1910_s0 + $0x8] sm:$0xff]  ;;  %s1235_s25 = sshll.u32 %s1913_s3, 4  ;;  %s1236_s25 = int_to_ptr.hbm [resolvable:$true] %s1235_s25 }
   0x5   :  { %488 = vmatpush.bf16.msra.mxu0 %v479_v4  ;;  %1630 = vmatpush.bf16.msra.mxu1 %v479_v4  ;;  %v1431_v8 = vld [vmem:[%s1910_s0 + $0xc0] sm:$0xff]  ;;  %v1416_v10 = vld [vmem:[%s1910_s0 + $0x48] sm:$0xff]  ;;  %v1409_v13 = vld [vmem:[%s1910_s0 + $0x10] sm:$0xff]  ;;  %s1666_s3 = smov 64   ;;  %s1667_s26 = smov 4  }
   0x6   :  { %1631 = vmatpush.bf16.msra.mxu2 %v479_v4  ;;  %1632 = vmatpush.bf16.msra.mxu3 %v479_v4  ;;  %v1424_v11 = vld [vmem:[%s1910_s0 + $0x88] sm:$0xff]  ;;  %v1417_v14 = vld [vmem:[%s1910_s0 + $0x50] sm:$0xff]  ;;  %v1410_v17 = vld [vmem:[%s1910_s0 + $0x18] sm:$0xff] }
   0x7   :  { %v1432_v12 = vld [vmem:[%s1910_s0 + $0xc8] sm:$0xff]  ;;  %v1425_v15 = vld [vmem:[%s1910_s0 + $0x90] sm:$0xff]  ;;  %v1418_v18 = vld [vmem:[%s1910_s0 + $0x58] sm:$0xff] }
   0x8   :  { %1375 = vmatmul.msk.bf16.vlgmr.msra.gmra.mxu0 %vm377_vm2, %v1407_v5  ;;  %1383 = vmatmul.msk.bf16.vlgmr.msra.gmra.mxu1 %vm377_vm2, %v1415_v6  ;;  %v1433_v16 = vld [vmem:[%s1910_s0 + $0xd0] sm:$0xff]  ;;  %v1426_v19 = vld [vmem:[%s1910_s0 + $0x98] sm:$0xff]  ;;  %v1411_v21 = vld [vmem:[%s1910_s0 + $0x20] sm:$0xff] }
   0x9   :  { %1391 = vmatmul.msk.bf16.vlgmr.msra.gmra.mxu2 %vm377_vm2, %v1423_v7  ;;  %1399 = vmatmul.msk.bf16.vlgmr.msra.gmra.mxu3 %vm377_vm2, %v1431_v8  ;;  %v1434_v20 = vld [vmem:[%s1910_s0 + $0xd8] sm:$0xff]  ;;  %v1419_v22 = vld [vmem:[%s1910_s0 + $0x60] sm:$0xff]  ;;  %v1412_v25 = vld [vmem:[%s1910_s0 + $0x28] sm:$0xff] }
   0xa   :  { %v1427_v23 = vld [vmem:[%s1910_s0 + $0xa0] sm:$0xff]  ;;  %v1420_v26 = vld [vmem:[%s1910_s0 + $0x68] sm:$0xff]  ;;  %v1413_v29 = vld [vmem:[%s1910_s0 + $0x30] sm:$0xff] }
   0xb   :  { %v1435_v24 = vld [vmem:[%s1910_s0 + $0xe0] sm:$0xff]  ;;  %v1428_v27 = vld [vmem:[%s1910_s0 + $0xa8] sm:$0xff]  ;;  %v1421_v30 = vld [vmem:[%s1910_s0 + $0x70] sm:$0xff] }
   0xc   :  { %v1436_v28 = vld [vmem:[%s1910_s0 + $0xe8] sm:$0xff]  ;;  %v1429_v31 = vld [vmem:[%s1910_s0 + $0xb0] sm:$0xff]  ;;  %v1414_v33 = vld [vmem:[%s1910_s0 + $0x38] sm:$0xff] }
   0xd   :  { %v1437_v32 = vld [vmem:[%s1910_s0 + $0xf0] sm:$0xff]  ;;  %v1422_v34 = vld [vmem:[%s1910_s0 + $0x78] sm:$0xff]  ;;  %v1822_v39 = vld [vmem:[%s1912_s2] ss:$0 sm:$0xff] }
   0xe   :  { %v1430_v35 = vld [vmem:[%s1910_s0 + $0xb8] sm:$0xff] }
   0xf   :  { %v1438_v36 = vld [vmem:[%s1910_s0 + $0xf8] sm:$0xff]  ;;  %s1665_s0 = smov [#allocation3]  }
  0x10   :  { %s1903_s2 = sshll.u32 %s1665_s0, 4  ;;  %s1234_s2 = int_to_ptr.vmem [resolvable:$true] %s1903_s2 }
  0x18   :  { %1376 = vmatmul.msk.bf16.gmra.mxu0 %vm377_vm2, %v1408_v9  ;;  %1384 = vmatmul.msk.bf16.gmra.mxu1 %vm377_vm2, %v1416_v10 }
  0x19   :  { %1392 = vmatmul.msk.bf16.gmra.mxu2 %vm377_vm2, %v1424_v11  ;;  %1400 = vmatmul.msk.bf16.gmra.mxu3 %vm377_vm2, %v1432_v12 }
  0x28   :  { %1377 = vmatmul.msk.bf16.gmra.mxu0 %vm377_vm2, %v1409_v13  ;;  %1385 = vmatmul.msk.bf16.gmra.mxu1 %vm377_vm2, %v1417_v14 }
  0x29   :  { %1393 = vmatmul.msk.bf16.gmra.mxu2 %vm377_vm2, %v1425_v15  ;;  %1401 = vmatmul.msk.bf16.gmra.mxu3 %vm377_vm2, %v1433_v16 }
  0x38   :  { %1378 = vmatmul.msk.bf16.gmra.mxu0 %vm377_vm2, %v1410_v17  ;;  %1386 = vmatmul.msk.bf16.gmra.mxu1 %vm377_vm2, %v1418_v18 }
  0x39   :  { %1394 = vmatmul.msk.bf16.gmra.mxu2 %vm377_vm2, %v1426_v19  ;;  %1402 = vmatmul.msk.bf16.gmra.mxu3 %vm377_vm2, %v1434_v20 }
  0x48   :  { %1379 = vmatmul.msk.bf16.gmra.mxu0 %vm377_vm2, %v1411_v21  ;;  %1387 = vmatmul.msk.bf16.gmra.mxu1 %vm377_vm2, %v1419_v22 }
  0x49   :  { %1395 = vmatmul.msk.bf16.gmra.mxu2 %vm377_vm2, %v1427_v23  ;;  %1403 = vmatmul.msk.bf16.gmra.mxu3 %vm377_vm2, %v1435_v24 }
  0x58   :  { %1380 = vmatmul.msk.bf16.gmra.mxu0 %vm377_vm2, %v1412_v25  ;;  %1388 = vmatmul.msk.bf16.gmra.mxu1 %vm377_vm2, %v1420_v26 }
  0x59   :  { %1396 = vmatmul.msk.bf16.gmra.mxu2 %vm377_vm2, %v1428_v27  ;;  %1404 = vmatmul.msk.bf16.gmra.mxu3 %vm377_vm2, %v1436_v28 }
  0x68   :  { %1381 = vmatmul.msk.bf16.gmra.mxu0 %vm377_vm2, %v1413_v29  ;;  %1389 = vmatmul.msk.bf16.gmra.mxu1 %vm377_vm2, %v1421_v30 }
  0x69   :  { %1397 = vmatmul.msk.bf16.gmra.mxu2 %vm377_vm2, %v1429_v31  ;;  %1405 = vmatmul.msk.bf16.gmra.mxu3 %vm377_vm2, %v1437_v32 }
  0x78   :  { %1382 = vmatmul.msk.bf16.gmra.mxu0 %vm377_vm2, %v1414_v33  ;;  %1390 = vmatmul.msk.bf16.gmra.mxu1 %vm377_vm2, %v1422_v34 }
  0x79   :  { %1398 = vmatmul.msk.bf16.gmra.mxu2 %vm377_vm2, %v1430_v35  ;;  %1406 = vmatmul.msk.bf16.gmra.mxu3 %vm377_vm2, %v1438_v36 }
  0x85   :  { %v490_v37 = vpop.f32.mrf.mxu0  ;;  %v530_v38 = vpop.f32.mrf.mxu1 }
  0x86   :  { %v650_v40 = vadd.f32 %v1822_v39, %v490_v37  ;;  %v666_v41 = vadd.f32 %v1822_v39, %v530_v38 }
  0x88   :  { %vm845_vm3 = vcmp.ge.f32.partialorder %v650_v40, 0.0  ;;  %v909_v46 = vmul.f32 1.4142135, %v650_v40  ;;  %v973_v49 = vmul.f32 0.28284273, %v650_v40  ;;  %vm861_vm4 = vcmp.ge.f32.partialorder %v666_v41, 0.0 }
  0x89   :  { %v925_v50 = vmul.f32 1.4142135, %v666_v41  ;;  %v989_v51 = vmul.f32 0.28284273, %v666_v41 }
  0x8a   :  { %v1037_v58 = vsel %vm845_vm3, %v909_v46, %v973_v49 }
  0x8b   :  { %v1053_v59 = vsel %vm861_vm4, %v925_v50, %v989_v51 }
  0x8c   :  { %v570_v42 = vpop.f32.mrf.mxu2  ;;  %v610_v43 = vpop.f32.mrf.mxu3 }
  0x8d   :  { %v492_v44 = vpop.f32.mrf.mxu0  ;;  %v532_v45 = vpop.f32.mrf.mxu1  ;;  %v682_v52 = vadd.f32 %v1822_v39, %v570_v42  ;;  %v698_v56 = vadd.f32 %v1822_v39, %v610_v43 }
  0x8e   :  { %v651_v47 = vadd.f32 %v1822_v39, %v492_v44  ;;  %v667_v48 = vadd.f32 %v1822_v39, %v532_v45 }
  0x8f   :  { %vm877_vm7 = vcmp.ge.f32.partialorder %v682_v52, 0.0  ;;  %v941_v61 = vmul.f32 1.4142135, %v682_v52  ;;  %v1005_v2 = vmul.f32 0.28284273, %v682_v52  ;;  %vm893_vm8 = vcmp.ge.f32.partialorder %v698_v56, 0.0 }
  0x90   :  { %vm846_vm5 = vcmp.ge.f32.partialorder %v651_v47, 0.0  ;;  %vm862_vm6 = vcmp.ge.f32.partialorder %v667_v48, 0.0  ;;  %v910_v53 = vmul.f32 1.4142135, %v651_v47  ;;  %v974_v54 = vmul.f32 0.28284273, %v651_v47 }
  0x91   :  { %v926_v55 = vmul.f32 1.4142135, %v667_v48  ;;  %v990_v57 = vmul.f32 0.28284273, %v667_v48  ;;  %v957_v8 = vmul.f32 1.4142135, %v698_v56  ;;  %v1069_v14 = vsel %vm877_vm7, %v941_v61, %v1005_v2 }
  0x92   :  { %v1038_v60 = vsel %vm846_vm5, %v910_v53, %v974_v54  ;;  %v1021_v9 = vmul.f32 0.28284273, %v698_v56 }
  0x93   :  { %v1442_v62 = vpack.c.bf16 %v1038_v60, %v1037_v58  ;;  %v1054_v63 = vsel %vm862_vm6, %v926_v55, %v990_v57 }
  0x94   :  { %v572_v0 = vpop.f32.mrf.mxu2  ;;  %v612_v1 = vpop.f32.mrf.mxu3  ;;  %v1482_v3 = vpack.c.bf16 %v1054_v63, %v1053_v59  ;;  %v1085_v16 = vsel %vm893_vm8, %v957_v8, %v1021_v9 }
  0x95   :  { %v683_v4 = vadd.f32 %v1822_v39, %v572_v0  ;;  %v699_v5 = vadd.f32 %v1822_v39, %v612_v1  ;;  %v495_v6 = vpop.f32.mrf.mxu0  ;;  %v535_v7 = vpop.f32.mrf.mxu1  ;;  %1443 = vst [vmem:[#allocation3] sm:$0xff] %v1442_v62  }
  0x96   :  { %1606 = vst [vmem:[#allocation3 + $0x40] sm:$0xff] %v1482_v3   ;;  %v652_v19 = vadd.f32 %v1822_v39, %v495_v6  ;;  %v668_v21 = vadd.f32 %v1822_v39, %v535_v7 }
  0x97   :  { %vm878_vm9 = vcmp.ge.f32.partialorder %v683_v4, 0.0  ;;  %v942_v10 = vmul.f32 1.4142135, %v683_v4  ;;  %v1006_v11 = vmul.f32 0.28284273, %v683_v4  ;;  %vm894_vm10 = vcmp.ge.f32.partialorder %v699_v5, 0.0 }
  0x98   :  { %v958_v12 = vmul.f32 1.4142135, %v699_v5  ;;  %v1022_v13 = vmul.f32 0.28284273, %v699_v5  ;;  %vm847_vm11 = vcmp.ge.f32.partialorder %v652_v19, 0.0  ;;  %vm863_vm12 = vcmp.ge.f32.partialorder %v668_v21, 0.0 }
  0x99   :  { %v1070_v15 = vsel %vm878_vm9, %v942_v10, %v1006_v11  ;;  %v911_v26 = vmul.f32 1.4142135, %v652_v19  ;;  %v975_v29 = vmul.f32 0.28284273, %v652_v19  ;;  %v927_v30 = vmul.f32 1.4142135, %v668_v21 }
  0x9a   :  { %v1522_v17 = vpack.c.bf16 %v1070_v15, %v1069_v14  ;;  %v1086_v18 = vsel %vm894_vm10, %v958_v12, %v1022_v13  ;;  %v991_v31 = vmul.f32 0.28284273, %v668_v21 }
  0x9b   :  { %v1562_v20 = vpack.c.bf16 %v1086_v18, %v1085_v16  ;;  %v1039_v38 = vsel %vm847_vm11, %v911_v26, %v975_v29 }
  0x9c   :  { %1614 = vst [vmem:[#allocation3 + $0x80] sm:$0xff] %v1522_v17   ;;  %v575_v22 = vpop.f32.mrf.mxu2  ;;  %v615_v23 = vpop.f32.mrf.mxu3  ;;  %v1055_v40 = vsel %vm863_vm12, %v927_v30, %v991_v31 }
  0x9d   :  { %1622 = vst [vmem:[#allocation3 + $0xc0] sm:$0xff] %v1562_v20   ;;  %v497_v24 = vpop.f32.mrf.mxu0  ;;  %v537_v25 = vpop.f32.mrf.mxu1  ;;  %v684_v32 = vadd.f32 %v1822_v39, %v575_v22  ;;  %v700_v36 = vadd.f32 %v1822_v39, %v615_v23 }
  0x9e   :  { %v653_v27 = vadd.f32 %v1822_v39, %v497_v24  ;;  %v669_v28 = vadd.f32 %v1822_v39, %v537_v25 }
  0x9f   :  { %vm879_vm15 = vcmp.ge.f32.partialorder %v684_v32, 0.0  ;;  %v943_v42 = vmul.f32 1.4142135, %v684_v32  ;;  %v1007_v47 = vmul.f32 0.28284273, %v684_v32  ;;  %vm895_vm0 = vcmp.ge.f32.partialorder %v700_v36, 0.0 }
  0xa0   :  { %vm848_vm13 = vcmp.ge.f32.partialorder %v653_v27, 0.0  ;;  %vm864_vm14 = vcmp.ge.f32.partialorder %v669_v28, 0.0  ;;  %v912_v33 = vmul.f32 1.4142135, %v653_v27  ;;  %v976_v34 = vmul.f32 0.28284273, %v653_v27 }
  0xa1   :  { %v928_v35 = vmul.f32 1.4142135, %v669_v28  ;;  %v992_v37 = vmul.f32 0.28284273, %v669_v28  ;;  %v959_v53 = vmul.f32 1.4142135, %v700_v36  ;;  %v1071_v59 = vsel %vm879_vm15, %v943_v42, %v1007_v47 }
  0xa2   :  { %v1040_v41 = vsel %vm848_vm13, %v912_v33, %v976_v34  ;;  %v1023_v54 = vmul.f32 0.28284273, %v700_v36 }
  0xa3   :  { %v1447_v43 = vpack.c.bf16 %v1040_v41, %v1039_v38  ;;  %v1056_v44 = vsel %vm864_vm14, %v928_v35, %v992_v37 }
  0xa4   :  { %v577_v45 = vpop.f32.mrf.mxu2  ;;  %v617_v46 = vpop.f32.mrf.mxu3  ;;  %v1487_v48 = vpack.c.bf16 %v1056_v44, %v1055_v40  ;;  %v1087_v61 = vsel %vm895_vm0, %v959_v53, %v1023_v54 }
  0xa5   :  { %v685_v49 = vadd.f32 %v1822_v39, %v577_v45  ;;  %v701_v50 = vadd.f32 %v1822_v39, %v617_v46  ;;  %v500_v51 = vpop.f32.mrf.mxu0  ;;  %v540_v52 = vpop.f32.mrf.mxu1  ;;  %1599 = vst [vmem:[#allocation3 + $0x8] sm:$0xff] %v1447_v43  }
  0xa6   :  { %1607 = vst [vmem:[#allocation3 + $0x48] sm:$0xff] %v1487_v48   ;;  %v654_v0 = vadd.f32 %v1822_v39, %v500_v51  ;;  %v670_v2 = vadd.f32 %v1822_v39, %v540_v52 }
  0xa7   :  { %vm880_vm1 = vcmp.ge.f32.partialorder %v685_v49, 0.0  ;;  %v944_v55 = vmul.f32 1.4142135, %v685_v49  ;;  %v1008_v56 = vmul.f32 0.28284273, %v685_v49  ;;  %vm896_vm2 = vcmp.ge.f32.partialorder %v701_v50, 0.0 }
  0xa8   :  { %v960_v57 = vmul.f32 1.4142135, %v701_v50  ;;  %v1024_v58 = vmul.f32 0.28284273, %v701_v50  ;;  %vm849_vm3 = vcmp.ge.f32.partialorder %v654_v0, 0.0  ;;  %vm865_vm4 = vcmp.ge.f32.partialorder %v670_v2, 0.0 }
  0xa9   :  { %v1072_v60 = vsel %vm880_vm1, %v944_v55, %v1008_v56  ;;  %v913_v7 = vmul.f32 1.4142135, %v654_v0  ;;  %v977_v10 = vmul.f32 0.28284273, %v654_v0  ;;  %v929_v11 = vmul.f32 1.4142135, %v670_v2 }
  0xaa   :  { %v1527_v62 = vpack.c.bf16 %v1072_v60, %v1071_v59  ;;  %v1088_v63 = vsel %vm896_vm2, %v960_v57, %v1024_v58  ;;  %v993_v12 = vmul.f32 0.28284273, %v670_v2 }
  0xab   :  { %v1567_v1 = vpack.c.bf16 %v1088_v63, %v1087_v61  ;;  %v1041_v19 = vsel %vm849_vm3, %v913_v7, %v977_v10 }
  0xac   :  { %1615 = vst [vmem:[#allocation3 + $0x88] sm:$0xff] %v1527_v62   ;;  %v580_v3 = vpop.f32.mrf.mxu2  ;;  %v620_v4 = vpop.f32.mrf.mxu3  ;;  %v1057_v20 = vsel %vm865_vm4, %v929_v11, %v993_v12 }
  0xad   :  { %1623 = vst [vmem:[#allocation3 + $0xc8] sm:$0xff] %v1567_v1   ;;  %v502_v5 = vpop.f32.mrf.mxu0  ;;  %v542_v6 = vpop.f32.mrf.mxu1  ;;  %v686_v13 = vadd.f32 %v1822_v39, %v580_v3  ;;  %v702_v17 = vadd.f32 %v1822_v39, %v620_v4 }
  0xae   :  { %v655_v8 = vadd.f32 %v1822_v39, %v502_v5  ;;  %v671_v9 = vadd.f32 %v1822_v39, %v542_v6 }
  0xaf   :  { %vm881_vm7 = vcmp.ge.f32.partialorder %v686_v13, 0.0  ;;  %v945_v22 = vmul.f32 1.4142135, %v686_v13  ;;  %v1009_v27 = vmul.f32 0.28284273, %v686_v13  ;;  %vm897_vm8 = vcmp.ge.f32.partialorder %v702_v17, 0.0 }
  0xb0   :  { %vm850_vm5 = vcmp.ge.f32.partialorder %v655_v8, 0.0  ;;  %vm866_vm6 = vcmp.ge.f32.partialorder %v671_v9, 0.0  ;;  %v914_v14 = vmul.f32 1.4142135, %v655_v8  ;;  %v978_v15 = vmul.f32 0.28284273, %v655_v8 }
  0xb1   :  { %v930_v16 = vmul.f32 1.4142135, %v671_v9  ;;  %v994_v18 = vmul.f32 0.28284273, %v671_v9  ;;  %v961_v33 = vmul.f32 1.4142135, %v702_v17  ;;  %v1073_v40 = vsel %vm881_vm7, %v945_v22, %v1009_v27 }
  0xb2   :  { %v1042_v21 = vsel %vm850_vm5, %v914_v14, %v978_v15  ;;  %v1025_v34 = vmul.f32 0.28284273, %v702_v17 }
  0xb3   :  { %v1452_v23 = vpack.c.bf16 %v1042_v21, %v1041_v19  ;;  %v1058_v24 = vsel %vm866_vm6, %v930_v16, %v994_v18 }
  0xb4   :  { %v582_v25 = vpop.f32.mrf.mxu2  ;;  %v622_v26 = vpop.f32.mrf.mxu3  ;;  %v1492_v28 = vpack.c.bf16 %v1058_v24, %v1057_v20  ;;  %v1089_v42 = vsel %vm897_vm8, %v961_v33, %v1025_v34 }
  0xb5   :  { %v687_v29 = vadd.f32 %v1822_v39, %v582_v25  ;;  %v703_v30 = vadd.f32 %v1822_v39, %v622_v26  ;;  %v505_v31 = vpop.f32.mrf.mxu0  ;;  %v545_v32 = vpop.f32.mrf.mxu1  ;;  %1600 = vst [vmem:[#allocation3 + $0x10] sm:$0xff] %v1452_v23  }
  0xb6   :  { %1608 = vst [vmem:[#allocation3 + $0x50] sm:$0xff] %v1492_v28   ;;  %v656_v45 = vadd.f32 %v1822_v39, %v505_v31  ;;  %v672_v47 = vadd.f32 %v1822_v39, %v545_v32 }
  0xb7   :  { %vm882_vm9 = vcmp.ge.f32.partialorder %v687_v29, 0.0  ;;  %v946_v35 = vmul.f32 1.4142135, %v687_v29  ;;  %v1010_v36 = vmul.f32 0.28284273, %v687_v29  ;;  %vm898_vm10 = vcmp.ge.f32.partialorder %v703_v30, 0.0 }
  0xb8   :  { %v962_v37 = vmul.f32 1.4142135, %v703_v30  ;;  %v1026_v38 = vmul.f32 0.28284273, %v703_v30  ;;  %vm851_vm11 = vcmp.ge.f32.partialorder %v656_v45, 0.0  ;;  %vm867_vm12 = vcmp.ge.f32.partialorder %v672_v47, 0.0 }
  0xb9   :  { %v1074_v41 = vsel %vm882_vm9, %v946_v35, %v1010_v36  ;;  %v915_v52 = vmul.f32 1.4142135, %v656_v45  ;;  %v979_v55 = vmul.f32 0.28284273, %v656_v45  ;;  %v931_v56 = vmul.f32 1.4142135, %v672_v47 }
  0xba   :  { %v1532_v43 = vpack.c.bf16 %v1074_v41, %v1073_v40  ;;  %v1090_v44 = vsel %vm898_vm10, %v962_v37, %v1026_v38  ;;  %v995_v57 = vmul.f32 0.28284273, %v672_v47 }
  0xbb   :  { %v1572_v46 = vpack.c.bf16 %v1090_v44, %v1089_v42  ;;  %v1043_v0 = vsel %vm851_vm11, %v915_v52, %v979_v55 }
  0xbc   :  { %1616 = vst [vmem:[#allocation3 + $0x90] sm:$0xff] %v1532_v43   ;;  %v585_v48 = vpop.f32.mrf.mxu2  ;;  %v625_v49 = vpop.f32.mrf.mxu3  ;;  %v1059_v1 = vsel %vm867_vm12, %v931_v56, %v995_v57 }
  0xbd   :  { %1624 = vst [vmem:[#allocation3 + $0xd0] sm:$0xff] %v1572_v46   ;;  %v507_v50 = vpop.f32.mrf.mxu0  ;;  %v547_v51 = vpop.f32.mrf.mxu1  ;;  %v688_v58 = vadd.f32 %v1822_v39, %v585_v48  ;;  %v704_v62 = vadd.f32 %v1822_v39, %v625_v49 }
  0xbe   :  { %v657_v53 = vadd.f32 %v1822_v39, %v507_v50  ;;  %v673_v54 = vadd.f32 %v1822_v39, %v547_v51 }
  0xbf   :  { %vm883_vm15 = vcmp.ge.f32.partialorder %v688_v58, 0.0  ;;  %v947_v3 = vmul.f32 1.4142135, %v688_v58  ;;  %v1011_v8 = vmul.f32 0.28284273, %v688_v58  ;;  %vm899_vm0 = vcmp.ge.f32.partialorder %v704_v62, 0.0 }
  0xc0   :  { %vm852_vm13 = vcmp.ge.f32.partialorder %v657_v53, 0.0  ;;  %vm868_vm14 = vcmp.ge.f32.partialorder %v673_v54, 0.0  ;;  %v916_v59 = vmul.f32 1.4142135, %v657_v53  ;;  %v980_v60 = vmul.f32 0.28284273, %v657_v53 }
  0xc1   :  { %v932_v61 = vmul.f32 1.4142135, %v673_v54  ;;  %v996_v63 = vmul.f32 0.28284273, %v673_v54  ;;  %v963_v14 = vmul.f32 1.4142135, %v704_v62  ;;  %v1075_v20 = vsel %vm883_vm15, %v947_v3, %v1011_v8 }
  0xc2   :  { %v1044_v2 = vsel %vm852_vm13, %v916_v59, %v980_v60  ;;  %v1027_v15 = vmul.f32 0.28284273, %v704_v62 }
  0xc3   :  { %v1457_v4 = vpack.c.bf16 %v1044_v2, %v1043_v0  ;;  %v1060_v5 = vsel %vm868_vm14, %v932_v61, %v996_v63 }
  0xc4   :  { %v587_v6 = vpop.f32.mrf.mxu2  ;;  %v627_v7 = vpop.f32.mrf.mxu3  ;;  %v1497_v9 = vpack.c.bf16 %v1060_v5, %v1059_v1  ;;  %v1091_v22 = vsel %vm899_vm0, %v963_v14, %v1027_v15 }
  0xc5   :  { %v689_v10 = vadd.f32 %v1822_v39, %v587_v6  ;;  %v705_v11 = vadd.f32 %v1822_v39, %v627_v7  ;;  %v510_v12 = vpop.f32.mrf.mxu0  ;;  %v550_v13 = vpop.f32.mrf.mxu1  ;;  %1601 = vst [vmem:[#allocation3 + $0x18] sm:$0xff] %v1457_v4  }
  0xc6   :  { %1609 = vst [vmem:[#allocation3 + $0x58] sm:$0xff] %v1497_v9   ;;  %v658_v25 = vadd.f32 %v1822_v39, %v510_v12  ;;  %v674_v27 = vadd.f32 %v1822_v39, %v550_v13 }
  0xc7   :  { %vm884_vm1 = vcmp.ge.f32.partialorder %v689_v10, 0.0  ;;  %v948_v16 = vmul.f32 1.4142135, %v689_v10  ;;  %v1012_v17 = vmul.f32 0.28284273, %v689_v10  ;;  %vm900_vm2 = vcmp.ge.f32.partialorder %v705_v11, 0.0 }
  0xc8   :  { %v964_v18 = vmul.f32 1.4142135, %v705_v11  ;;  %v1028_v19 = vmul.f32 0.28284273, %v705_v11  ;;  %vm853_vm3 = vcmp.ge.f32.partialorder %v658_v25, 0.0  ;;  %vm869_vm4 = vcmp.ge.f32.partialorder %v674_v27, 0.0 }
  0xc9   :  { %v1076_v21 = vsel %vm884_vm1, %v948_v16, %v1012_v17  ;;  %v917_v32 = vmul.f32 1.4142135, %v658_v25  ;;  %v981_v35 = vmul.f32 0.28284273, %v658_v25  ;;  %v933_v36 = vmul.f32 1.4142135, %v674_v27 }
  0xca   :  { %v1537_v23 = vpack.c.bf16 %v1076_v21, %v1075_v20  ;;  %v1092_v24 = vsel %vm900_vm2, %v964_v18, %v1028_v19  ;;  %v997_v37 = vmul.f32 0.28284273, %v674_v27 }
  0xcb   :  { %v1577_v26 = vpack.c.bf16 %v1092_v24, %v1091_v22  ;;  %v1045_v45 = vsel %vm853_vm3, %v917_v32, %v981_v35 }
  0xcc   :  { %1617 = vst [vmem:[#allocation3 + $0x98] sm:$0xff] %v1537_v23   ;;  %v590_v28 = vpop.f32.mrf.mxu2  ;;  %v630_v29 = vpop.f32.mrf.mxu3  ;;  %v1061_v46 = vsel %vm869_vm4, %v933_v36, %v997_v37 }
  0xcd   :  { %1625 = vst [vmem:[#allocation3 + $0xd8] sm:$0xff] %v1577_v26   ;;  %v512_v30 = vpop.f32.mrf.mxu0  ;;  %v552_v31 = vpop.f32.mrf.mxu1  ;;  %v690_v38 = vadd.f32 %v1822_v39, %v590_v28  ;;  %v706_v43 = vadd.f32 %v1822_v39, %v630_v29 }
  0xce   :  { %v659_v33 = vadd.f32 %v1822_v39, %v512_v30  ;;  %v675_v34 = vadd.f32 %v1822_v39, %v552_v31 }
  0xcf   :  { %vm885_vm7 = vcmp.ge.f32.partialorder %v690_v38, 0.0  ;;  %v949_v48 = vmul.f32 1.4142135, %v690_v38  ;;  %v1013_v53 = vmul.f32 0.28284273, %v690_v38  ;;  %vm901_vm8 = vcmp.ge.f32.partialorder %v706_v43, 0.0 }
  0xd0   :  { %vm854_vm5 = vcmp.ge.f32.partialorder %v659_v33, 0.0  ;;  %vm870_vm6 = vcmp.ge.f32.partialorder %v675_v34, 0.0  ;;  %v918_v40 = vmul.f32 1.4142135, %v659_v33  ;;  %v982_v41 = vmul.f32 0.28284273, %v659_v33 }
  0xd1   :  { %v934_v42 = vmul.f32 1.4142135, %v675_v34  ;;  %v998_v44 = vmul.f32 0.28284273, %v675_v34  ;;  %v965_v59 = vmul.f32 1.4142135, %v706_v43  ;;  %v1077_v1 = vsel %vm885_vm7, %v949_v48, %v1013_v53 }
  0xd2   :  { %v1046_v47 = vsel %vm854_vm5, %v918_v40, %v982_v41  ;;  %v1029_v60 = vmul.f32 0.28284273, %v706_v43 }
  0xd3   :  { %v1462_v49 = vpack.c.bf16 %v1046_v47, %v1045_v45  ;;  %v1062_v50 = vsel %vm870_vm6, %v934_v42, %v998_v44 }
  0xd4   :  { %v592_v51 = vpop.f32.mrf.mxu2  ;;  %v632_v52 = vpop.f32.mrf.mxu3  ;;  %v1502_v54 = vpack.c.bf16 %v1062_v50, %v1061_v46  ;;  %v1093_v3 = vsel %vm901_vm8, %v965_v59, %v1029_v60 }
  0xd5   :  { %v691_v55 = vadd.f32 %v1822_v39, %v592_v51  ;;  %v707_v56 = vadd.f32 %v1822_v39, %v632_v52  ;;  %v515_v57 = vpop.f32.mrf.mxu0  ;;  %v555_v58 = vpop.f32.mrf.mxu1  ;;  %1602 = vst [vmem:[#allocation3 + $0x20] sm:$0xff] %v1462_v49  }
  0xd6   :  { %1610 = vst [vmem:[#allocation3 + $0x60] sm:$0xff] %v1502_v54   ;;  %v660_v6 = vadd.f32 %v1822_v39, %v515_v57  ;;  %v676_v8 = vadd.f32 %v1822_v39, %v555_v58 }
  0xd7   :  { %vm886_vm9 = vcmp.ge.f32.partialorder %v691_v55, 0.0  ;;  %v950_v61 = vmul.f32 1.4142135, %v691_v55  ;;  %v1014_v62 = vmul.f32 0.28284273, %v691_v55  ;;  %vm902_vm10 = vcmp.ge.f32.partialorder %v707_v56, 0.0 }
  0xd8   :  { %v966_v63 = vmul.f32 1.4142135, %v707_v56  ;;  %v1030_v0 = vmul.f32 0.28284273, %v707_v56  ;;  %vm855_vm11 = vcmp.ge.f32.partialorder %v660_v6, 0.0  ;;  %vm871_vm12 = vcmp.ge.f32.partialorder %v676_v8, 0.0 }
  0xd9   :  { %v1078_v2 = vsel %vm886_vm9, %v950_v61, %v1014_v62  ;;  %v919_v13 = vmul.f32 1.4142135, %v660_v6  ;;  %v983_v16 = vmul.f32 0.28284273, %v660_v6  ;;  %v935_v17 = vmul.f32 1.4142135, %v676_v8 }
  0xda   :  { %v1542_v4 = vpack.c.bf16 %v1078_v2, %v1077_v1  ;;  %v1094_v5 = vsel %vm902_vm10, %v966_v63, %v1030_v0  ;;  %v999_v18 = vmul.f32 0.28284273, %v676_v8 }
  0xdb   :  { %v1582_v7 = vpack.c.bf16 %v1094_v5, %v1093_v3  ;;  %v1047_v25 = vsel %vm855_vm11, %v919_v13, %v983_v16 }
  0xdc   :  { %1618 = vst [vmem:[#allocation3 + $0xa0] sm:$0xff] %v1542_v4   ;;  %v595_v9 = vpop.f32.mrf.mxu2  ;;  %v635_v10 = vpop.f32.mrf.mxu3  ;;  %v1063_v26 = vsel %vm871_vm12, %v935_v17, %v999_v18 }
  0xdd   :  { %1626 = vst [vmem:[#allocation3 + $0xe0] sm:$0xff] %v1582_v7   ;;  %v517_v11 = vpop.f32.mrf.mxu0  ;;  %v557_v12 = vpop.f32.mrf.mxu1  ;;  %v692_v19 = vadd.f32 %v1822_v39, %v595_v9  ;;  %v708_v23 = vadd.f32 %v1822_v39, %v635_v10 }
  0xde   :  { %v661_v14 = vadd.f32 %v1822_v39, %v517_v11  ;;  %v677_v15 = vadd.f32 %v1822_v39, %v557_v12 }
  0xdf   :  { %vm887_vm15 = vcmp.ge.f32.partialorder %v692_v19, 0.0  ;;  %v951_v28 = vmul.f32 1.4142135, %v692_v19  ;;  %v1015_v33 = vmul.f32 0.28284273, %v692_v19  ;;  %vm903_vm0 = vcmp.ge.f32.partialorder %v708_v23, 0.0 }
  0xe0   :  { %vm856_vm13 = vcmp.ge.f32.partialorder %v661_v14, 0.0  ;;  %vm872_vm14 = vcmp.ge.f32.partialorder %v677_v15, 0.0  ;;  %v920_v20 = vmul.f32 1.4142135, %v661_v14  ;;  %v984_v21 = vmul.f32 0.28284273, %v661_v14 }
  0xe1   :  { %v936_v22 = vmul.f32 1.4142135, %v677_v15  ;;  %v1000_v24 = vmul.f32 0.28284273, %v677_v15  ;;  %v967_v40 = vmul.f32 1.4142135, %v708_v23  ;;  %v1079_v46 = vsel %vm887_vm15, %v951_v28, %v1015_v33 }
  0xe2   :  { %v1048_v27 = vsel %vm856_vm13, %v920_v20, %v984_v21  ;;  %v1031_v41 = vmul.f32 0.28284273, %v708_v23 }
  0xe3   :  { %v1467_v29 = vpack.c.bf16 %v1048_v27, %v1047_v25  ;;  %v1064_v30 = vsel %vm872_vm14, %v936_v22, %v1000_v24 }
  0xe4   :  { %v597_v31 = vpop.f32.mrf.mxu2  ;;  %v637_v32 = vpop.f32.mrf.mxu3  ;;  %v1507_v34 = vpack.c.bf16 %v1064_v30, %v1063_v26  ;;  %v1095_v48 = vsel %vm903_vm0, %v967_v40, %v1031_v41 }
  0xe5   :  { %v693_v35 = vadd.f32 %v1822_v39, %v597_v31  ;;  %v709_v36 = vadd.f32 %v1822_v39, %v637_v32  ;;  %v520_v37 = vpop.f32.mrf.mxu0  ;;  %v560_v38 = vpop.f32.mrf.mxu1  ;;  %1603 = vst [vmem:[#allocation3 + $0x28] sm:$0xff] %v1467_v29  }
  0xe6   :  { %1611 = vst [vmem:[#allocation3 + $0x68] sm:$0xff] %v1507_v34   ;;  %v662_v51 = vadd.f32 %v1822_v39, %v520_v37  ;;  %v678_v53 = vadd.f32 %v1822_v39, %v560_v38 }
  0xe7   :  { %vm888_vm1 = vcmp.ge.f32.partialorder %v693_v35, 0.0  ;;  %v952_v42 = vmul.f32 1.4142135, %v693_v35  ;;  %v1016_v43 = vmul.f32 0.28284273, %v693_v35  ;;  %vm904_vm2 = vcmp.ge.f32.partialorder %v709_v36, 0.0 }
  0xe8   :  { %v968_v44 = vmul.f32 1.4142135, %v709_v36  ;;  %v1032_v45 = vmul.f32 0.28284273, %v709_v36  ;;  %vm857_vm3 = vcmp.ge.f32.partialorder %v662_v51, 0.0  ;;  %vm873_vm4 = vcmp.ge.f32.partialorder %v678_v53, 0.0 }
  0xe9   :  { %v1080_v47 = vsel %vm888_vm1, %v952_v42, %v1016_v43  ;;  %v921_v58 = vmul.f32 1.4142135, %v662_v51  ;;  %v985_v61 = vmul.f32 0.28284273, %v662_v51  ;;  %v937_v62 = vmul.f32 1.4142135, %v678_v53 }
  0xea   :  { %v1547_v49 = vpack.c.bf16 %v1080_v47, %v1079_v46  ;;  %v1096_v50 = vsel %vm904_vm2, %v968_v44, %v1032_v45  ;;  %v1001_v63 = vmul.f32 0.28284273, %v678_v53 }
  0xeb   :  { %v1587_v52 = vpack.c.bf16 %v1096_v50, %v1095_v48  ;;  %v1049_v6 = vsel %vm857_vm3, %v921_v58, %v985_v61 }
  0xec   :  { %1619 = vst [vmem:[#allocation3 + $0xa8] sm:$0xff] %v1547_v49   ;;  %v600_v54 = vpop.f32.mrf.mxu2  ;;  %v640_v55 = vpop.f32.mrf.mxu3  ;;  %v1065_v7 = vsel %vm873_vm4, %v937_v62, %v1001_v63 }
  0xed   :  { %1627 = vst [vmem:[#allocation3 + $0xe8] sm:$0xff] %v1587_v52   ;;  %v522_v56 = vpop.f32.mrf.mxu0  ;;  %v562_v57 = vpop.f32.mrf.mxu1  ;;  %v694_v0 = vadd.f32 %v1822_v39, %v600_v54  ;;  %v710_v4 = vadd.f32 %v1822_v39, %v640_v55 }
  0xee   :  { %v663_v59 = vadd.f32 %v1822_v39, %v522_v56  ;;  %v679_v60 = vadd.f32 %v1822_v39, %v562_v57 }
  0xef   :  { %vm889_vm7 = vcmp.ge.f32.partialorder %v694_v0, 0.0  ;;  %v953_v9 = vmul.f32 1.4142135, %v694_v0  ;;  %v1017_v14 = vmul.f32 0.28284273, %v694_v0  ;;  %vm905_vm8 = vcmp.ge.f32.partialorder %v710_v4, 0.0 }
  0xf0   :  { %vm858_vm5 = vcmp.ge.f32.partialorder %v663_v59, 0.0  ;;  %vm874_vm6 = vcmp.ge.f32.partialorder %v679_v60, 0.0  ;;  %v922_v1 = vmul.f32 1.4142135, %v663_v59  ;;  %v986_v2 = vmul.f32 0.28284273, %v663_v59 }
  0xf1   :  { %v938_v3 = vmul.f32 1.4142135, %v679_v60  ;;  %v1002_v5 = vmul.f32 0.28284273, %v679_v60  ;;  %v969_v20 = vmul.f32 1.4142135, %v710_v4  ;;  %v1081_v26 = vsel %vm889_vm7, %v953_v9, %v1017_v14 }
  0xf2   :  { %v1050_v8 = vsel %vm858_vm5, %v922_v1, %v986_v2  ;;  %v1033_v21 = vmul.f32 0.28284273, %v710_v4 }
  0xf3   :  { %v1472_v10 = vpack.c.bf16 %v1050_v8, %v1049_v6  ;;  %v1066_v11 = vsel %vm874_vm6, %v938_v3, %v1002_v5 }
  0xf4   :  { %v602_v12 = vpop.f32.mrf.mxu2  ;;  %v642_v13 = vpop.f32.mrf.mxu3  ;;  %v1512_v15 = vpack.c.bf16 %v1066_v11, %v1065_v7  ;;  %v1097_v28 = vsel %vm905_vm8, %v969_v20, %v1033_v21 }
  0xf5   :  { %v695_v16 = vadd.f32 %v1822_v39, %v602_v12  ;;  %v711_v17 = vadd.f32 %v1822_v39, %v642_v13  ;;  %v525_v18 = vpop.f32.mrf.mxu0  ;;  %v565_v19 = vpop.f32.mrf.mxu1  ;;  %1604 = vst [vmem:[#allocation3 + $0x30] sm:$0xff] %v1472_v10  }
  0xf6   :  { %1612 = vst [vmem:[#allocation3 + $0x70] sm:$0xff] %v1512_v15   ;;  %v664_v31 = vadd.f32 %v1822_v39, %v525_v18  ;;  %v680_v33 = vadd.f32 %v1822_v39, %v565_v19 }
  0xf7   :  { %vm890_vm9 = vcmp.ge.f32.partialorder %v695_v16, 0.0  ;;  %v954_v22 = vmul.f32 1.4142135, %v695_v16  ;;  %v1018_v23 = vmul.f32 0.28284273, %v695_v16  ;;  %vm906_vm10 = vcmp.ge.f32.partialorder %v711_v17, 0.0 }
  0xf8   :  { %v970_v24 = vmul.f32 1.4142135, %v711_v17  ;;  %v1034_v25 = vmul.f32 0.28284273, %v711_v17  ;;  %vm859_vm11 = vcmp.ge.f32.partialorder %v664_v31, 0.0  ;;  %vm875_vm12 = vcmp.ge.f32.partialorder %v680_v33, 0.0 }
  0xf9   :  { %v1082_v27 = vsel %vm890_vm9, %v954_v22, %v1018_v23  ;;  %v923_v38 = vmul.f32 1.4142135, %v664_v31  ;;  %v987_v42 = vmul.f32 0.28284273, %v664_v31  ;;  %v939_v43 = vmul.f32 1.4142135, %v680_v33 }
  0xfa   :  { %v1552_v29 = vpack.c.bf16 %v1082_v27, %v1081_v26  ;;  %v1098_v30 = vsel %vm906_vm10, %v970_v24, %v1034_v25  ;;  %v1003_v44 = vmul.f32 0.28284273, %v680_v33 }
  0xfb   :  { %v1592_v32 = vpack.c.bf16 %v1098_v30, %v1097_v28  ;;  %v1051_v51 = vsel %vm859_vm11, %v923_v38, %v987_v42 }
  0xfc   :  { %1620 = vst [vmem:[#allocation3 + $0xb0] sm:$0xff] %v1552_v29   ;;  %v605_v34 = vpop.f32.mrf.mxu2  ;;  %v645_v35 = vpop.f32.mrf.mxu3  ;;  %v1067_v52 = vsel %vm875_vm12, %v939_v43, %v1003_v44 }
  0xfd   :  { %1628 = vst [vmem:[#allocation3 + $0xf0] sm:$0xff] %v1592_v32   ;;  %v527_v36 = vpop.f32.mrf.mxu0  ;;  %v567_v37 = vpop.f32.mrf.mxu1  ;;  %v696_v45 = vadd.f32 %v1822_v39, %v605_v34  ;;  %v712_v49 = vadd.f32 %v1822_v39, %v645_v35 }
  0xfe   :  { %v665_v40 = vadd.f32 %v1822_v39, %v527_v36  ;;  %v681_v41 = vadd.f32 %v1822_v39, %v567_v37 }
  0xff   :  { %vm891_vm15 = vcmp.ge.f32.partialorder %v696_v45, 0.0  ;;  %v955_v54 = vmul.f32 1.4142135, %v696_v45  ;;  %v1019_v59 = vmul.f32 0.28284273, %v696_v45  ;;  %vm907_vm0 = vcmp.ge.f32.partialorder %v712_v49, 0.0 }
 0x100   :  { %vm860_vm13 = vcmp.ge.f32.partialorder %v665_v40, 0.0  ;;  %vm876_vm14 = vcmp.ge.f32.partialorder %v681_v41, 0.0  ;;  %v924_v46 = vmul.f32 1.4142135, %v665_v40  ;;  %v988_v47 = vmul.f32 0.28284273, %v665_v40 }
 0x101   :  { %v940_v48 = vmul.f32 1.4142135, %v681_v41  ;;  %v1004_v50 = vmul.f32 0.28284273, %v681_v41  ;;  %v971_v63 = vmul.f32 1.4142135, %v712_v49 }
 0x102   :  { %v1052_v53 = vsel %vm860_vm13, %v924_v46, %v988_v47  ;;  %v1035_v0 = vmul.f32 0.28284273, %v712_v49 }
 0x103   :  { %v1477_v55 = vpack.c.bf16 %v1052_v53, %v1051_v51  ;;  %v1068_v56 = vsel %vm876_vm14, %v940_v48, %v1004_v50 }
 0x104   :  { %v607_v57 = vpop.f32.mrf.mxu2  ;;  %v647_v58 = vpop.f32.mrf.mxu3  ;;  %v1517_v60 = vpack.c.bf16 %v1068_v56, %v1067_v52  ;;  %v1099_v6 = vsel %vm907_vm0, %v971_v63, %v1035_v0 }
 0x105   :  { %v697_v61 = vadd.f32 %v1822_v39, %v607_v57  ;;  %v713_v62 = vadd.f32 %v1822_v39, %v647_v58  ;;  %1605 = vst [vmem:[#allocation3 + $0x38] sm:$0xff] %v1477_v55   ;;  %v1083_v39 = vsel %vm891_vm15, %v955_v54, %v1019_v59 }
 0x106   :  { %1613 = vst [vmem:[#allocation3 + $0x78] sm:$0xff] %v1517_v60  }
 0x107   :  { %vm892_vm1 = vcmp.ge.f32.partialorder %v697_v61, 0.0  ;;  %v956_v1 = vmul.f32 1.4142135, %v697_v61  ;;  %v1020_v2 = vmul.f32 0.28284273, %v697_v61  ;;  %vm908_vm2 = vcmp.ge.f32.partialorder %v713_v62, 0.0 }
 0x108   :  { %v972_v3 = vmul.f32 1.4142135, %v713_v62  ;;  %v1036_v4 = vmul.f32 0.28284273, %v713_v62 }
 0x109   :  { %v1084_v5 = vsel %vm892_vm1, %v956_v1, %v1020_v2 }
 0x10a   :  { %v1557_v7 = vpack.c.bf16 %v1084_v5, %v1083_v39  ;;  %v1100_v8 = vsel %vm908_vm2, %v972_v3, %v1036_v4 }
 0x10b   :  { %v1597_v9 = vpack.c.bf16 %v1100_v8, %v1099_v6 }
 0x10c   :  { %1621 = vst [vmem:[#allocation3 + $0xb8] sm:$0xff] %v1557_v7  }
 0x10d   :  { %1629 = vst [vmem:[#allocation3 + $0xf8] sm:$0xff] %v1597_v9  }
 0x10e   :  { %1241 = dma.vmem_to_hbm [thread:$0]  %s1234_s2, 4096, %s1236_s25, [#allocation4], %s1666_s3, %s1666_s3, %s1667_s26  }
 0x10f   :  { %1662 = dma.done.wait [#allocation4], 4096  }
 0x110   :  { %1663 = vsyncadd [#allocation4], 4294963200 }
 0x111   :  { %1246 = vsyncpa [#allocation4], 1 }

</bundles_post_ra>
